<compile_context>
chip_gen: v7x
topology: tpu7x:2x2x1
jax: 0.10.0
libtpu: 0.0.40
codegen_flags: <defaults>
</compile_context>

<pallas_src>
from functools import partial

import jax
import jax.numpy as jnp
from jax.experimental import pallas as pl
from jax.experimental.pallas import tpu as pltpu

LANE = 128


def _round_up(n, m):
    return ((n + m - 1) // m) * m


def default_elem_dtype():
    """bf16 elementwise on chips with a bf16 VPU/EUP (v6e+), f32 otherwise."""
    kind = jax.devices()[0].device_kind.lower()
    if "tpu" not in kind or any(v in kind for v in ("v2", "v3", "v4", "v5")):
        return jnp.float32
    return jnp.bfloat16


def _fcnet_math(x, w_se1, b_se1, w_se2, b_se2, w1, b1, a1, w2, b2, a2,
                wfc, bfc, elem_dtype):
    """Shared math (kernel + reference): bf16 matmul inputs, f32 accumulation,
    elementwise in `elem_dtype`, sigmoid and final bias add in f32."""
    def mm(a, w):
        return jnp.dot(a.astype(jnp.bfloat16), w,
                       preferred_element_type=jnp.float32)

    # ---- SEScale: sigmoid(fc2(relu(fc1(x)))) * x ----
    s = mm(x, w_se1).astype(elem_dtype) + b_se1
    s = jnp.maximum(s, 0.0)
    s = mm(s, w_se2) + b_se2                       # f32
    s = jax.nn.sigmoid(s).astype(elem_dtype)       # exp on the EUP in f32
    x = s * x.astype(elem_dtype)

    # ---- linear1 + PReLU (single shared alpha); dropout (eval) = identity ----
    h = mm(x, w1).astype(elem_dtype) + b1
    h = jnp.where(h >= 0.0, h, a1 * h)

    # ---- linear2 + PReLU; dropout (eval) = identity ----
    h = mm(h, w2).astype(elem_dtype) + b2
    h = jnp.where(h >= 0.0, h, a2 * h)

    # ---- fc (bias add in f32; caller casts to the storage dtype) ----
    return mm(h, wfc) + bfc


def fcnet_kernel(x_ref,
                 w_se1_ref, b_se1_ref, w_se2_ref, b_se2_ref,
                 w1_ref, b1_ref, a1_ref,
                 w2_ref, b2_ref, a2_ref,
                 wfc_ref, bfc_ref,
                 out_ref, *, n_sub, sub_rows, elem_dtype):
    # VMEM-resident bf16 weights (constant index_map -> no per-step re-DMA).
    w_se1 = w_se1_ref[...]
    w_se2 = w_se2_ref[...]
    w1 = w1_ref[...]
    w2 = w2_ref[...]
    wfc = wfc_ref[...]

    # Hoist bias broadcasts out of the unrolled sub-tile loop (JAX does not CSE
    # broadcast_in_dim: one materialization per grid step instead of n_sub x 5).
    def bcast(b_ref, dt):
        return jnp.broadcast_to(b_ref[...].astype(dt),
                                (sub_rows, b_ref.shape[1]))

    b_se1 = bcast(b_se1_ref, elem_dtype)
    b_se2 = bcast(b_se2_ref, jnp.float32)    # sigmoid input stays f32
    b1 = bcast(b1_ref, elem_dtype)
    b2 = bcast(b2_ref, elem_dtype)
    bfc = bcast(bfc_ref, jnp.float32)        # final bias add in f32

    a1 = a1_ref[0, 0].astype(elem_dtype)     # PReLU shared alphas (SMEM scalars)
    a2 = a2_ref[0, 0].astype(elem_dtype)

    # Static unroll over independent batch sub-tiles: the 5-deep serial matmul
    # chains of different sub-tiles interleave, hiding MXU/EUP result latency.
    for t in range(n_sub):
        r0 = t * sub_rows
        x = x_ref[pl.ds(r0, sub_rows), :]
        y = _fcnet_math(x, w_se1, b_se1, w_se2, b_se2, w1, b1, a1,
                        w2, b2, a2, wfc, bfc, elem_dtype)
        out_ref[pl.ds(r0, sub_rows), :] = y.astype(out_ref.dtype)


def init_params(key, in_channels, num_classes, base_size=64, reduction_scale=8):
    """Deterministic synthetic parameters.  Internal feature dims (reduction,
    2*base, base, num_classes) are zero-padded to 128 lanes; the in_channels
    dim keeps its natural size (it sets the x HBM stream width).  Weights are
    bf16 (MXU path), biases f32.  Zero padding is exact: every padded weight
    row/col and bias lane is 0, so padded lanes stay 0 through relu/PReLU and
    contribute nothing to downstream matmuls."""
    reduction = max(1, in_channels // reduction_scale)
    ks = jax.random.split(key, 10)

    def lin(kw, kb, fan_in, fan_out, pad_in, pad_out):
        w = jax.random.normal(kw, (fan_in, fan_out), jnp.float32) * 0.1
        b = jax.random.normal(kb, (1, fan_out), jnp.float32) * 0.05
        fi = _round_up(fan_in, LANE) if pad_in else fan_in
        fo = _round_up(fan_out, LANE) if pad_out else fan_out
        wp = jnp.zeros((fi, fo), jnp.float32).at[:fan_in, :fan_out].set(w)
        bp = jnp.zeros((1, fo), jnp.float32).at[:, :fan_out].set(b)
        return wp.astype(jnp.bfloat16), bp

    w_se1, b_se1 = lin(ks[0], ks[1], in_channels, reduction, False, True)
    w_se2, b_se2 = lin(ks[2], ks[3], reduction, in_channels, True, False)
    w1, b1 = lin(ks[4], ks[5], in_channels, base_size * 2, False, True)
    w2, b2 = lin(ks[6], ks[7], base_size * 2, base_size, True, True)
    wfc, bfc = lin(ks[8], ks[9], base_size, num_classes, True, True)
    # PReLU default init: single shared parameter = 0.25, as (1,1) SMEM scalar.
    a1 = jnp.full((1, 1), 0.25, jnp.float32)
    a2 = jnp.full((1, 1), 0.25, jnp.float32)
    return dict(w_se1=w_se1, b_se1=b_se1, w_se2=w_se2, b_se2=b_se2,
                w1=w1, b1=b1, a1=a1, w2=w2, b2=b2, a2=a2, wfc=wfc, bfc=bfc)


def fcnet_forward(x, p, num_classes, *, block_batch=1024, n_sub=2,
                  elem_dtype=None):
    if elem_dtype is None:
        elem_dtype = default_elem_dtype()

    B, C = x.shape
    R_pad = p["w_se1"].shape[1]
    H1_pad = p["w1"].shape[1]
    H2_pad = p["w2"].shape[1]
    NC_pad = p["wfc"].shape[1]

    # --- batch tiling -------------------------------------------------------
    SUB_Q = 16                                    # bf16 sublane-packing quantum
    B_q = _round_up(B, SUB_Q)                     # minimal batch rounding only
    n_blocks = max(1, pl.cdiv(B_q, block_batch))
    if n_blocks > 1 and n_blocks % 2:
        n_blocks += 1                             # v7x: even block count -> both TCs fed
    blk = _round_up(pl.cdiv(B_q, n_blocks), SUB_Q)
    # Interleave sub-chains only while each chain keeps M >= 128 per matmul.
    n_sub_eff = max(1, min(n_sub, blk // 128))
    blk = _round_up(blk, SUB_Q * n_sub_eff)
    sub_rows = blk // n_sub_eff
    B_pad = blk * n_blocks

    xp = x if B_pad == B else jnp.pad(x, ((0, B_pad - B), (0, 0)))

    def const_spec(a):
        return pl.BlockSpec(a.shape, lambda i: (0,) * a.ndim)

    smem_scalar = pl.BlockSpec((1, 1), lambda i: (0, 0),
                               memory_space=pltpu.MemorySpace.SMEM)

    weight_keys = ("w_se1", "b_se1", "w_se2", "b_se2",
                   "w1", "b1", "w2", "b2", "wfc", "bfc")
    flops = 2 * B_pad * (C * R_pad + R_pad * C
                         + C * H1_pad + H1_pad * H2_pad + H2_pad * NC_pad)
    bytes_accessed = (B_pad * C * 4 + B_pad * NC_pad * 2
                      + sum(int(p[k].size) * p[k].dtype.itemsize
                            for k in weight_keys))
    cost = pl.CostEstimate(flops=flops, transcendentals=B_pad * C,
                           bytes_accessed=bytes_accessed)

    out = pl.pallas_call(
        partial(fcnet_kernel, n_sub=n_sub_eff, sub_rows=sub_rows,
                elem_dtype=elem_dtype),
        out_shape=jax.ShapeDtypeStruct((B_pad, NC_pad), jnp.bfloat16),
        grid=(n_blocks,),
        in_specs=[
            pl.BlockSpec((blk, C), lambda i: (i, 0)),        # x, natural C width
            const_spec(p["w_se1"]), const_spec(p["b_se1"]),
            const_spec(p["w_se2"]), const_spec(p["b_se2"]),
            const_spec(p["w1"]), const_spec(p["b1"]), smem_scalar,   # a1
            const_spec(p["w2"]), const_spec(p["b2"]), smem_scalar,   # a2
            const_spec(p["wfc"]), const_spec(p["bfc"]),
        ],
        out_specs=pl.BlockSpec((blk, NC_pad), lambda i: (i, 0)),
        compiler_params=pltpu.CompilerParams(
            dimension_semantics=("parallel",),
            vmem_limit_bytes=64 * 1024 * 1024),
        cost_estimate=cost,
    )(xp, p["w_se1"], p["b_se1"], p["w_se2"], p["b_se2"],
      p["w1"], p["b1"], p["a1"],
      p["w2"], p["b2"], p["a2"],
      p["wfc"], p["bfc"])

    return out[:B, :num_classes].astype(jnp.float32)


def fcnet_reference(x, p, num_classes, elem_dtype):
    """Pure-JAX reference mirroring the kernel's dtypes (bf16 matmul inputs,
    elem_dtype elementwise, bf16 output storage)."""
    y = _fcnet_math(
        x,
        p["w_se1"], p["b_se1"].astype(elem_dtype),
        p["w_se2"], p["b_se2"].astype(jnp.float32),
        p["w1"], p["b1"].astype(elem_dtype), p["a1"][0, 0].astype(elem_dtype),
        p["w2"], p["b2"].astype(elem_dtype), p["a2"][0, 0].astype(elem_dtype),
        p["wfc"], p["bfc"].astype(jnp.float32), elem_dtype)
    y = y.astype(jnp.bfloat16).astype(jnp.float32)   # mirror bf16 output storage
    return y[:, :num_classes]


if __name__ == "__main__":
    key = jax.random.PRNGKey(0)
    k_x, k_p = jax.random.split(key)

    B = 64
    in_channels = 32
    num_classes = 10
    base_size = 32
    reduction_scale = 8

    x = jax.random.normal(k_x, (B, in_channels), jnp.float32)
    params = init_params(k_p, in_channels, num_classes,
                         base_size=base_size, reduction_scale=reduction_scale)

    elem_dtype = default_elem_dtype()
    out = fcnet_forward(x, params, num_classes, elem_dtype=elem_dtype)
    out = jax.block_until_ready(out)

    ref = fcnet_reference(x, params, num_classes, elem_dtype)
    assert out.shape == (B, num_classes)
    max_err = float(jnp.max(jnp.abs(out - ref)))
    assert jnp.allclose(out, ref, atol=2e-2, rtol=2e-2), max_err

    print("KERNEL_OK")
</pallas_src>

<mosaic_0001>
module attributes {stable_mosaic.version = 11 : i64} {
  func.func @fcnet_kernel(%arg0: i32, %arg1: memref<64x32xf32, #tpu.memory_space<vmem>>, %arg2: memref<32x128xbf16, #tpu.memory_space<vmem>>, %arg3: memref<1x128xf32, #tpu.memory_space<vmem>>, %arg4: memref<128x32xbf16, #tpu.memory_space<vmem>>, %arg5: memref<1x32xf32, #tpu.memory_space<vmem>>, %arg6: memref<32x128xbf16, #tpu.memory_space<vmem>>, %arg7: memref<1x128xf32, #tpu.memory_space<vmem>>, %arg8: memref<1x1xf32, #tpu.memory_space<smem>>, %arg9: memref<128x128xbf16, #tpu.memory_space<vmem>>, %arg10: memref<1x128xf32, #tpu.memory_space<vmem>>, %arg11: memref<1x1xf32, #tpu.memory_space<smem>>, %arg12: memref<128x128xbf16, #tpu.memory_space<vmem>>, %arg13: memref<1x128xf32, #tpu.memory_space<vmem>>, %arg14: memref<64x128xbf16, #tpu.memory_space<vmem>>) attributes {dimension_semantics = [#tpu.dimension_semantics<parallel>], iteration_bounds = array<i64: 1>, scalar_prefetch = 0 : i64, scratch_operands = 0 : i64, tpu.core_type = #tpu.core_type<tc>, window_params = [{transform_indices = @transform_0, window_bounds = array<i64: 64, 32>}, {pipeline_mode = #tpu.pipeline_mode<synchronous>, transform_indices = @transform_1, window_bounds = array<i64: 32, 128>}, {pipeline_mode = #tpu.pipeline_mode<synchronous>, transform_indices = @transform_2, window_bounds = array<i64: 1, 128>}, {pipeline_mode = #tpu.pipeline_mode<synchronous>, transform_indices = @transform_3, window_bounds = array<i64: 128, 32>}, {pipeline_mode = #tpu.pipeline_mode<synchronous>, transform_indices = @transform_4, window_bounds = array<i64: 1, 32>}, {pipeline_mode = #tpu.pipeline_mode<synchronous>, transform_indices = @transform_5, window_bounds = array<i64: 32, 128>}, {pipeline_mode = #tpu.pipeline_mode<synchronous>, transform_indices = @transform_6, window_bounds = array<i64: 1, 128>}, {transform_indices = @transform_7, window_bounds = array<i64: 1, 1>}, {pipeline_mode = #tpu.pipeline_mode<synchronous>, transform_indices = @transform_8, window_bounds = array<i64: 128, 128>}, {pipeline_mode = #tpu.pipeline_mode<synchronous>, transform_indices = @transform_9, window_bounds = array<i64: 1, 128>}, {transform_indices = @transform_10, window_bounds = array<i64: 1, 1>}, {pipeline_mode = #tpu.pipeline_mode<synchronous>, transform_indices = @transform_11, window_bounds = array<i64: 128, 128>}, {pipeline_mode = #tpu.pipeline_mode<synchronous>, transform_indices = @transform_12, window_bounds = array<i64: 1, 128>}, {transform_indices = @transform_13, window_bounds = array<i64: 64, 128>}]} {
    %c0 = arith.constant 0 : index
    %c0_0 = arith.constant 0 : index
    %0 = vector.load %arg2[%c0, %c0_0] : memref<32x128xbf16, #tpu.memory_space<vmem>>, vector<32x128xbf16>
    %c0_1 = arith.constant 0 : index
    %c0_2 = arith.constant 0 : index
    %1 = vector.load %arg4[%c0_1, %c0_2] : memref<128x32xbf16, #tpu.memory_space<vmem>>, vector<128x32xbf16>
    %c0_3 = arith.constant 0 : index
    %c0_4 = arith.constant 0 : index
    %2 = vector.load %arg6[%c0_3, %c0_4] : memref<32x128xbf16, #tpu.memory_space<vmem>>, vector<32x128xbf16>
    %c0_5 = arith.constant 0 : index
    %c0_6 = arith.constant 0 : index
    %3 = vector.load %arg9[%c0_5, %c0_6] : memref<128x128xbf16, #tpu.memory_space<vmem>>, vector<128x128xbf16>
    %c0_7 = arith.constant 0 : index
    %c0_8 = arith.constant 0 : index
    %4 = vector.load %arg12[%c0_7, %c0_8] : memref<128x128xbf16, #tpu.memory_space<vmem>>, vector<128x128xbf16>
    %c0_9 = arith.constant 0 : index
    %c0_10 = arith.constant 0 : index
    %5 = vector.load %arg3[%c0_9, %c0_10] : memref<1x128xf32, #tpu.memory_space<vmem>>, vector<1x128xf32>
    %6 = vector.shape_cast %5 : vector<1x128xf32> to vector<1x128xf32>
    %7 = vector.broadcast %6 : vector<1x128xf32> to vector<64x128xf32>
    %c0_11 = arith.constant 0 : index
    %c0_12 = arith.constant 0 : index
    %8 = vector.load %arg5[%c0_11, %c0_12] : memref<1x32xf32, #tpu.memory_space<vmem>>, vector<1x32xf32>
    %9 = vector.shape_cast %8 : vector<1x32xf32> to vector<1x32xf32>
    %10 = vector.broadcast %9 : vector<1x32xf32> to vector<64x32xf32>
    %c0_13 = arith.constant 0 : index
    %c0_14 = arith.constant 0 : index
    %11 = vector.load %arg7[%c0_13, %c0_14] : memref<1x128xf32, #tpu.memory_space<vmem>>, vector<1x128xf32>
    %12 = vector.shape_cast %11 : vector<1x128xf32> to vector<1x128xf32>
    %13 = vector.broadcast %12 : vector<1x128xf32> to vector<64x128xf32>
    %c0_15 = arith.constant 0 : index
    %c0_16 = arith.constant 0 : index
    %14 = vector.load %arg10[%c0_15, %c0_16] : memref<1x128xf32, #tpu.memory_space<vmem>>, vector<1x128xf32>
    %15 = vector.shape_cast %14 : vector<1x128xf32> to vector<1x128xf32>
    %16 = vector.broadcast %15 : vector<1x128xf32> to vector<64x128xf32>
    %c0_17 = arith.constant 0 : index
    %c0_18 = arith.constant 0 : index
    %17 = vector.load %arg13[%c0_17, %c0_18] : memref<1x128xf32, #tpu.memory_space<vmem>>, vector<1x128xf32>
    %18 = vector.shape_cast %17 : vector<1x128xf32> to vector<1x128xf32>
    %19 = vector.broadcast %18 : vector<1x128xf32> to vector<64x128xf32>
    %c0_19 = arith.constant 0 : index
    %c0_20 = arith.constant 0 : index
    %20 = memref.load %arg8[%c0_19, %c0_20] : memref<1x1xf32, #tpu.memory_space<smem>>
    %c0_21 = arith.constant 0 : index
    %c0_22 = arith.constant 0 : index
    %21 = memref.load %arg11[%c0_21, %c0_22] : memref<1x1xf32, #tpu.memory_space<smem>>
    %c0_23 = arith.constant 0 : index
    %c0_24 = arith.constant 0 : index
    %22 = vector.load %arg1[%c0_23, %c0_24] : memref<64x32xf32, #tpu.memory_space<vmem>>, vector<64x32xf32>
    %23 = arith.truncf %22 : vector<64x32xf32> to vector<64x32xbf16>
    %cst = arith.constant dense<0.000000e+00> : vector<64x128xf32>
    %24 = tpu.matmul %23, %0, %cst {dimension_numbers = #tpu.dot_dimension_numbers<[1], [0], [0], [1], [0, 0, 1, 1], [], []>} : vector<64x32xbf16>, vector<32x128xbf16>, vector<64x128xf32> -> vector<64x128xf32>
    %25 = arith.addf %24, %7 : vector<64x128xf32>
    %cst_25 = arith.constant 0.000000e+00 : f32
    %26 = vector.broadcast %cst_25 : f32 to vector<64x128xf32>
    %27 = arith.maximumf %25, %26 : vector<64x128xf32>
    %28 = arith.truncf %27 : vector<64x128xf32> to vector<64x128xbf16>
    %cst_26 = arith.constant dense<0.000000e+00> : vector<64x32xf32>
    %29 = tpu.matmul %28, %1, %cst_26 {dimension_numbers = #tpu.dot_dimension_numbers<[1], [0], [0], [1], [0, 0, 1, 1], [], []>} : vector<64x128xbf16>, vector<128x32xbf16>, vector<64x32xf32> -> vector<64x32xf32>
    %30 = arith.addf %29, %10 : vector<64x32xf32>
    %31 = arith.negf %30 : vector<64x32xf32>
    %32 = math.exp %31 : vector<64x32xf32>
    %cst_27 = arith.constant 1.000000e+00 : f32
    %33 = vector.broadcast %cst_27 : f32 to vector<64x32xf32>
    %34 = arith.addf %33, %32 : vector<64x32xf32>
    %35 = arith.divf %33, %34 : vector<64x32xf32>
    %36 = arith.mulf %35, %22 : vector<64x32xf32>
    %37 = arith.truncf %36 : vector<64x32xf32> to vector<64x32xbf16>
    %cst_28 = arith.constant dense<0.000000e+00> : vector<64x128xf32>
    %38 = tpu.matmul %37, %2, %cst_28 {dimension_numbers = #tpu.dot_dimension_numbers<[1], [0], [0], [1], [0, 0, 1, 1], [], []>} : vector<64x32xbf16>, vector<32x128xbf16>, vector<64x128xf32> -> vector<64x128xf32>
    %39 = arith.addf %38, %13 : vector<64x128xf32>
    %cst_29 = arith.constant 0.000000e+00 : f32
    %40 = vector.broadcast %cst_29 : f32 to vector<64x128xf32>
    %41 = arith.cmpf oge, %39, %40 : vector<64x128xf32>
    %42 = vector.broadcast %20 : f32 to vector<64x128xf32>
    %43 = arith.mulf %42, %39 : vector<64x128xf32>
    %44 = arith.select %41, %39, %43 : vector<64x128xi1>, vector<64x128xf32>
    %45 = arith.truncf %44 : vector<64x128xf32> to vector<64x128xbf16>
    %cst_30 = arith.constant dense<0.000000e+00> : vector<64x128xf32>
    %46 = tpu.matmul %45, %3, %cst_30 {dimension_numbers = #tpu.dot_dimension_numbers<[1], [0], [0], [1], [0, 0, 1, 1], [], []>} : vector<64x128xbf16>, vector<128x128xbf16>, vector<64x128xf32> -> vector<64x128xf32>
    %47 = arith.addf %46, %16 : vector<64x128xf32>
    %cst_31 = arith.constant 0.000000e+00 : f32
    %48 = vector.broadcast %cst_31 : f32 to vector<64x128xf32>
    %49 = arith.cmpf oge, %47, %48 : vector<64x128xf32>
    %50 = vector.broadcast %21 : f32 to vector<64x128xf32>
    %51 = arith.mulf %50, %47 : vector<64x128xf32>
    %52 = arith.select %49, %47, %51 : vector<64x128xi1>, vector<64x128xf32>
    %53 = arith.truncf %52 : vector<64x128xf32> to vector<64x128xbf16>
    %cst_32 = arith.constant dense<0.000000e+00> : vector<64x128xf32>
    %54 = tpu.matmul %53, %4, %cst_32 {dimension_numbers = #tpu.dot_dimension_numbers<[1], [0], [0], [1], [0, 0, 1, 1], [], []>} : vector<64x128xbf16>, vector<128x128xbf16>, vector<64x128xf32> -> vector<64x128xf32>
    %55 = arith.addf %54, %19 : vector<64x128xf32>
    %56 = arith.truncf %55 : vector<64x128xf32> to vector<64x128xbf16>
    %c0_33 = arith.constant 0 : index
    %c0_34 = arith.constant 0 : index
    %57 = vector.load %arg14[%c0_33, %c0_34] : memref<64x128xbf16, #tpu.memory_space<vmem>>, vector<64x128xbf16>
    tpu.vector_store %arg14[%c0_33, %c0_34], %56 {strides = array<i32>} : memref<64x128xbf16, #tpu.memory_space<vmem>>, vector<64x128xbf16>,
    return
  }
  func.func @transform_0(%arg0: i32) -> (i32, i32) {
    %c0_i32 = arith.constant 0 : i32
    %c0_i32_0 = arith.constant 0 : i32
    return %arg0, %c0_i32 : i32, i32
  }
  func.func @transform_1(%arg0: i32) -> (i32, i32) {
    %c0_i32 = arith.constant 0 : i32
    %c0_i32_0 = arith.constant 0 : i32
    %c0_i32_1 = arith.constant 0 : i32
    return %c0_i32, %c0_i32_0 : i32, i32
  }
  func.func @transform_2(%arg0: i32) -> (i32, i32) {
    %c0_i32 = arith.constant 0 : i32
    %c0_i32_0 = arith.constant 0 : i32
    %c0_i32_1 = arith.constant 0 : i32
    return %c0_i32, %c0_i32_0 : i32, i32
  }
  func.func @transform_3(%arg0: i32) -> (i32, i32) {
    %c0_i32 = arith.constant 0 : i32
    %c0_i32_0 = arith.constant 0 : i32
    %c0_i32_1 = arith.constant 0 : i32
    return %c0_i32, %c0_i32_0 : i32, i32
  }
  func.func @transform_4(%arg0: i32) -> (i32, i32) {
    %c0_i32 = arith.constant 0 : i32
    %c0_i32_0 = arith.constant 0 : i32
    %c0_i32_1 = arith.constant 0 : i32
    return %c0_i32, %c0_i32_0 : i32, i32
  }
  func.func @transform_5(%arg0: i32) -> (i32, i32) {
    %c0_i32 = arith.constant 0 : i32
    %c0_i32_0 = arith.constant 0 : i32
    %c0_i32_1 = arith.constant 0 : i32
    return %c0_i32, %c0_i32_0 : i32, i32
  }
  func.func @transform_6(%arg0: i32) -> (i32, i32) {
    %c0_i32 = arith.constant 0 : i32
    %c0_i32_0 = arith.constant 0 : i32
    %c0_i32_1 = arith.constant 0 : i32
    return %c0_i32, %c0_i32_0 : i32, i32
  }
  func.func @transform_7(%arg0: i32) -> (i32, i32) {
    %c0_i32 = arith.constant 0 : i32
    %c0_i32_0 = arith.constant 0 : i32
    %c0_i32_1 = arith.constant 0 : i32
    return %c0_i32, %c0_i32_0 : i32, i32
  }
  func.func @transform_8(%arg0: i32) -> (i32, i32) {
    %c0_i32 = arith.constant 0 : i32
    %c0_i32_0 = arith.constant 0 : i32
    %c0_i32_1 = arith.constant 0 : i32
    return %c0_i32, %c0_i32_0 : i32, i32
  }
  func.func @transform_9(%arg0: i32) -> (i32, i32) {
    %c0_i32 = arith.constant 0 : i32
    %c0_i32_0 = arith.constant 0 : i32
    %c0_i32_1 = arith.constant 0 : i32
    return %c0_i32, %c0_i32_0 : i32, i32
  }
  func.func @transform_10(%arg0: i32) -> (i32, i32) {
    %c0_i32 = arith.constant 0 : i32
    %c0_i32_0 = arith.constant 0 : i32
    %c0_i32_1 = arith.constant 0 : i32
    return %c0_i32, %c0_i32_0 : i32, i32
  }
  func.func @transform_11(%arg0: i32) -> (i32, i32) {
    %c0_i32 = arith.constant 0 : i32
    %c0_i32_0 = arith.constant 0 : i32
    %c0_i32_1 = arith.constant 0 : i32
    return %c0_i32, %c0_i32_0 : i32, i32
  }
  func.func @transform_12(%arg0: i32) -> (i32, i32) {
    %c0_i32 = arith.constant 0 : i32
    %c0_i32_0 = arith.constant 0 : i32
    %c0_i32_1 = arith.constant 0 : i32
    return %c0_i32, %c0_i32_0 : i32, i32
  }
  func.func @transform_13(%arg0: i32) -> (i32, i32) {
    %c0_i32 = arith.constant 0 : i32
    %c0_i32_0 = arith.constant 0 : i32
    return %arg0, %c0_i32 : i32, i32
  }
}

</mosaic_0001>

<bundles_post_ra>
// kernel: tpu_custom_call.1
= control target key start
LH: loop header
LB: loop body
LE: loop exit
PB: predicated region body
PF: predicated region fallthrough
CT: control target
= control target key end

     0   :  { %20 = vsyncpa [#allocation5], 0  ;;  %s1886_s0 = inlined_call_operand.hbm [shape: f32[64,32], index: 0, kind: input, shape index: {}]   ;;  %s1887_s1 = inlined_call_operand.hbm [shape: bf16[32,128], index: 1, kind: input, shape index: {}]   ;;  %s1888_s2 = inlined_call_operand.hbm [shape: f32[1,128], index: 2, kind: input, shape index: {}]   ;;  %s1889_s3 = inlined_call_operand.hbm [shape: bf16[128,32], index: 3, kind: input, shape index: {}]   ;;  %s1890_s4 = inlined_call_operand.hbm [shape: f32[1,32], index: 4, kind: input, shape index: {}]   ;;  %s1891_s5 = inlined_call_operand.hbm [shape: bf16[32,128], index: 5, kind: input, shape index: {}]   ;;  %s1892_s6 = inlined_call_operand.hbm [shape: f32[1,128], index: 6, kind: input, shape index: {}]   ;;  %s1893_s7 = inlined_call_operand.<no memory space> [shape: f32[1,1], index: 7, kind: input, shape index: {}]   ;;  %s1894_s8 = inlined_call_operand.hbm [shape: bf16[128,128], index: 8, kind: input, shape index: {}]   ;;  %s1895_s9 = inlined_call_operand.hbm [shape: f32[1,128], index: 9, kind: input, shape index: {}]   ;;  %s1896_s10 = inlined_call_operand.<no memory space> [shape: f32[1,1], index: 10, kind: input, shape index: {}]   ;;  %s1897_s11 = inlined_call_operand.hbm [shape: bf16[128,128], index: 11, kind: input, shape index: {}]   ;;  %s1898_s12 = inlined_call_operand.hbm [shape: f32[1,128], index: 12, kind: input, shape index: {}]   ;;  %s1899_s13 = inlined_call_operand.hbm [shape: bf16[64,128], index: 13, kind: output, shape index: {}]  }
   0x1   :  { %21 = vsyncpa [#allocation8], 0 }
   0x2   :  { %22 = vsyncpa [#allocation11], 0 }
   0x3   :  { %23 = vsyncpa [#allocation14], 0 }
   0x4   :  { %24 = vsyncpa [#allocation17], 0 }
   0x5   :  { %25 = vsyncpa [#allocation20], 0 }
   0x6   :  { %26 = vsyncpa [#allocation6], 0  ;;  %s1588_s25 = smov [#allocation7]   ;;  %s1310_s29 = scalar_lea.hbm %s1887_s1, 256 }
   0x7   :  { %s44_s26 = sshll.u32 %s1588_s25, 4  ;;  %p1311_p0 = scmp.ne.s32.totalorder %s1887_s1, %s1310_s29  ;;  %s45_s26 = int_to_ptr.vmem [resolvable:$true] %s44_s26 }
   0x8   :  { %p1314_p1 = scmp.lt.u32.totalorder %s1310_s29, %s1887_s1 }
   0xa   :  { %p1316_p2 = pnand %p1314_p1, %p1311_p0 }
   0xc   :  { %1319 = shalt.err (!%p1316_p2)
}
   0xd   :  { %s1320_s17 = scalar_lea.vmem %s45_s26, 256  ;;  %p1325_p4 = scmp.lt.s32.totalorder %s45_s26, %s45_s26 }
   0xe   :  { %p1321_p3 = scmp.ne.s32.totalorder %s45_s26, %s1320_s17  ;;  %p1326_p5 = scmp.lt.s32.totalorder %s1320_s17, %s1320_s17 }
  0x10   :  { %p1327_p6 = por %p1326_p5, %p1325_p4 }
  0x12   :  { %p1328_p7 = pnand %p1327_p6, %p1321_p3 }
  0x14   :  { %1331 = shalt.err (!%p1328_p7)
}
  0x15   :  { %s1589_s18 = smov 64   ;;  %s1590_s19 = smov 4  }
  0x16   :  { %50 = dma.hbm_to_vmem [thread:$0]  %s1887_s1, 256, %s45_s26, [#allocation8], %s1589_s18, %s1589_s18, %s1590_s19  }
  0x17   :  { %s1591_s22 = smov [#allocation10]   ;;  %s1592_s24 = smov [#allocation13]  }
  0x18   :  { %s66_s23 = sshll.u32 %s1591_s22, 4  ;;  %s88_s25 = sshll.u32 %s1592_s24, 4  ;;  %s67_s23 = int_to_ptr.vmem [resolvable:$true] %s66_s23  ;;  %s89_s25 = int_to_ptr.vmem [resolvable:$true] %s88_s25 }
  0x19   :  { %s1332_s29 = scalar_lea.hbm %s1889_s3, 1024 }
  0x1a   :  { %p1333_p8 = scmp.ne.s32.totalorder %s1889_s3, %s1332_s29  ;;  %p1336_p9 = scmp.lt.u32.totalorder %s1332_s29, %s1889_s3 }
  0x1c   :  { %p1338_p10 = pnand %p1336_p9, %p1333_p8 }
  0x1e   :  { %1341 = shalt.err (!%p1338_p10)
}
  0x1f   :  { %s1342_s1 = scalar_lea.vmem %s67_s23, 1024  ;;  %p1347_p12 = scmp.lt.s32.totalorder %s67_s23, %s67_s23 }
  0x20   :  { %p1343_p11 = scmp.ne.s32.totalorder %s67_s23, %s1342_s1  ;;  %p1348_p13 = scmp.lt.s32.totalorder %s1342_s1, %s1342_s1 }
  0x22   :  { %p1349_p0 = por %p1348_p13, %p1347_p12 }
  0x24   :  { %p1350_p1 = pnand %p1349_p0, %p1343_p11 }
  0x26   :  { %1353 = shalt.err (!%p1350_p1)
}
  0x27   :  { %72 = dma.hbm_to_vmem [thread:$0]  %s1889_s3, 1024, %s67_s23, [#allocation11], %s1589_s18, %s1589_s18, %s1590_s19  }
  0x28   :  { %s1354_s22 = scalar_lea.hbm %s1891_s5, 256 }
  0x29   :  { %p1355_p2 = scmp.ne.s32.totalorder %s1891_s5, %s1354_s22  ;;  %p1358_p3 = scmp.lt.u32.totalorder %s1354_s22, %s1891_s5 }
  0x2b   :  { %p1360_p4 = pnand %p1358_p3, %p1355_p2 }
  0x2d   :  { %1363 = shalt.err (!%p1360_p4)
}
  0x2e   :  { %s1364_s30 = scalar_lea.vmem %s89_s25, 256  ;;  %p1369_p6 = scmp.lt.s32.totalorder %s89_s25, %s89_s25 }
  0x2f   :  { %p1365_p5 = scmp.ne.s32.totalorder %s89_s25, %s1364_s30  ;;  %p1370_p7 = scmp.lt.s32.totalorder %s1364_s30, %s1364_s30 }
  0x31   :  { %p1371_p8 = por %p1370_p7, %p1369_p6 }
  0x33   :  { %p1372_p9 = pnand %p1371_p8, %p1365_p5 }
  0x35   :  { %1375 = shalt.err (!%p1372_p9)
}
  0x36   :  { %94 = dma.hbm_to_vmem [thread:$0]  %s1891_s5, 256, %s89_s25, [#allocation14], %s1589_s18, %s1589_s18, %s1590_s19  }
  0x37   :  { %s1593_s14 = smov [#allocation16]   ;;  %s1594_s16 = smov [#allocation19]  }
  0x38   :  { %s112_s15 = sshll.u32 %s1593_s14, 4  ;;  %s136_s1 = sshll.u32 %s1594_s16, 4  ;;  %s113_s15 = int_to_ptr.vmem [resolvable:$true] %s112_s15  ;;  %s137_s1 = int_to_ptr.vmem [resolvable:$true] %s136_s1 }
  0x39   :  { %s1376_s20 = scalar_lea.hbm %s1894_s8, 1024 }
  0x3a   :  { %p1377_p10 = scmp.ne.s32.totalorder %s1894_s8, %s1376_s20  ;;  %p1380_p11 = scmp.lt.u32.totalorder %s1376_s20, %s1894_s8 }
  0x3c   :  { %p1382_p12 = pnand %p1380_p11, %p1377_p10 }
  0x3e   :  { %1385 = shalt.err (!%p1382_p12)
}
  0x3f   :  { %s1386_s5 = scalar_lea.vmem %s113_s15, 1024  ;;  %p1391_p0 = scmp.lt.s32.totalorder %s113_s15, %s113_s15 }
  0x40   :  { %p1387_p13 = scmp.ne.s32.totalorder %s113_s15, %s1386_s5  ;;  %p1392_p1 = scmp.lt.s32.totalorder %s1386_s5, %s1386_s5 }
  0x42   :  { %p1393_p2 = por %p1392_p1, %p1391_p0 }
  0x44   :  { %p1394_p3 = pnand %p1393_p2, %p1387_p13 }
  0x46   :  { %1397 = shalt.err (!%p1394_p3)
}
  0x47   :  { %118 = dma.hbm_to_vmem [thread:$0]  %s1894_s8, 1024, %s113_s15, [#allocation17], %s1589_s18, %s1589_s18, %s1590_s19  }
  0x48   :  { %s1398_s3 = scalar_lea.hbm %s1897_s11, 1024 }
  0x49   :  { %p1399_p4 = scmp.ne.s32.totalorder %s1897_s11, %s1398_s3  ;;  %p1402_p5 = scmp.lt.u32.totalorder %s1398_s3, %s1897_s11 }
  0x4b   :  { %p1404_p6 = pnand %p1402_p5, %p1399_p4 }
  0x4d   :  { %1407 = shalt.err (!%p1404_p6)
}
  0x4e   :  { %s1408_s17 = scalar_lea.vmem %s137_s1, 1024  ;;  %p1413_p8 = scmp.lt.s32.totalorder %s137_s1, %s137_s1 }
  0x4f   :  { %p1409_p7 = scmp.ne.s32.totalorder %s137_s1, %s1408_s17  ;;  %p1414_p9 = scmp.lt.s32.totalorder %s1408_s17, %s1408_s17 }
  0x51   :  { %p1415_p10 = por %p1414_p9, %p1413_p8 }
  0x53   :  { %p1416_p11 = pnand %p1415_p10, %p1409_p7 }
  0x55   :  { %1419 = shalt.err (!%p1416_p11)
}
  0x56   :  { %142 = dma.hbm_to_vmem [thread:$0]  %s1897_s11, 1024, %s137_s1, [#allocation20], %s1589_s18, %s1589_s18, %s1590_s19  }
  0x57   :  { %s1595_s20 = smov [#allocation4]   ;;  %s1420_s27 = scalar_lea.hbm %s1886_s0, 1024 }
  0x58   :  { %s32_s21 = sshll.u32 %s1595_s20, 4  ;;  %p1421_p12 = scmp.ne.s32.totalorder %s1886_s0, %s1420_s27  ;;  %s33_s21 = int_to_ptr.vmem [resolvable:$true] %s32_s21 }
  0x59   :  { %p1424_p13 = scmp.lt.u32.totalorder %s1420_s27, %s1886_s0 }
  0x5b   :  { %p1426_p0 = pnand %p1424_p13, %p1421_p12 }
  0x5d   :  { %1429 = shalt.err (!%p1426_p0)
}
  0x5e   :  { %s1430_s30 = scalar_lea.vmem %s33_s21, 1024  ;;  %p1435_p2 = scmp.lt.s32.totalorder %s33_s21, %s33_s21 }
  0x5f   :  { %p1431_p1 = scmp.ne.s32.totalorder %s33_s21, %s1430_s30  ;;  %p1436_p3 = scmp.lt.s32.totalorder %s1430_s30, %s1430_s30 }
  0x61   :  { %p1437_p4 = por %p1436_p3, %p1435_p2 }
  0x63   :  { %p1438_p5 = pnand %p1437_p4, %p1431_p1 }
  0x65   :  { %1441 = shalt.err (!%p1438_p5)
}
  0x66   :  { %s1596_s11 = smov 128   ;;  %s1597_s1 = smov 8  }
  0x67   :  { %38 = dma.hbm_to_vmem [thread:$0]  %s1886_s0, 1024, %s33_s21, [#allocation5], %s1596_s11, %s1596_s11, %s1597_s1  }
  0x68   :  { %s1598_s14 = smov [#allocation9]   ;;  %s1599_s26 = smov [#allocation12]  }
  0x69   :  { %s57_s16 = sshll.u32 %s1598_s14, 4  ;;  %s79_s17 = sshll.u32 %s1599_s26, 4  ;;  %s58_s16 = int_to_ptr.vmem [resolvable:$true] %s57_s16  ;;  %s80_s17 = int_to_ptr.vmem [resolvable:$true] %s79_s17 }
  0x6a   :  { %s1442_s20 = scalar_lea.hbm %s1888_s2, 16 }
  0x6b   :  { %p1443_p6 = scmp.ne.s32.totalorder %s1888_s2, %s1442_s20  ;;  %p1446_p7 = scmp.lt.u32.totalorder %s1442_s20, %s1888_s2 }
  0x6d   :  { %p1448_p8 = pnand %p1446_p7, %p1443_p6 }
  0x6f   :  { %1451 = shalt.err (!%p1448_p8)
}
  0x70   :  { %s1452_s0 = scalar_lea.vmem %s58_s16, 16  ;;  %s1456_s21 = scalar_lea.vmem %s58_s16, 32 }
  0x71   :  { %p1453_p9 = scmp.ne.s32.totalorder %s58_s16, %s1452_s0  ;;  %p1457_p10 = scmp.lt.s32.totalorder %s58_s16, %s58_s16 }
  0x72   :  { %p1458_p11 = scmp.lt.s32.totalorder %s1456_s21, %s1452_s0 }
  0x74   :  { %p1459_p12 = por %p1458_p11, %p1457_p10 }
  0x76   :  { %p1460_p13 = pnand %p1459_p12, %p1453_p9 }
  0x78   :  { %1463 = shalt.err (!%p1460_p13)
}
  0x79   :  { %60 = dma.hbm_to_vmem [thread:$0]  %s1888_s2, 16, %s58_s16, [#allocation8]  }
  0x7a   :  { %s1464_s11 = scalar_lea.hbm %s1890_s4, 16 }
  0x7b   :  { %p1465_p0 = scmp.ne.s32.totalorder %s1890_s4, %s1464_s11  ;;  %p1468_p1 = scmp.lt.u32.totalorder %s1464_s11, %s1890_s4 }
  0x7d   :  { %p1470_p2 = pnand %p1468_p1, %p1465_p0 }
  0x7f   :  { %1473 = shalt.err (!%p1470_p2)
}
  0x80   :  { %s1474_s26 = scalar_lea.vmem %s80_s17, 16  ;;  %s1478_s8 = scalar_lea.vmem %s80_s17, 32 }
  0x81   :  { %p1475_p3 = scmp.ne.s32.totalorder %s80_s17, %s1474_s26  ;;  %p1479_p4 = scmp.lt.s32.totalorder %s80_s17, %s80_s17 }
  0x82   :  { %p1480_p5 = scmp.lt.s32.totalorder %s1478_s8, %s1474_s26 }
  0x84   :  { %p1481_p6 = por %p1480_p5, %p1479_p4 }
  0x86   :  { %p1482_p7 = pnand %p1481_p6, %p1475_p3 }
  0x88   :  { %1485 = shalt.err (!%p1482_p7)
}
  0x89   :  { %82 = dma.hbm_to_vmem [thread:$0]  %s1890_s4, 16, %s80_s17, [#allocation11]  }
  0x8a   :  { %s1600_s15 = smov [#allocation15]   ;;  %s1601_s22 = smov [#allocation18]  }
  0x8b   :  { %s101_s20 = sshll.u32 %s1600_s15, 4  ;;  %s125_s24 = sshll.u32 %s1601_s22, 4  ;;  %s102_s20 = int_to_ptr.vmem [resolvable:$true] %s101_s20  ;;  %s126_s24 = int_to_ptr.vmem [resolvable:$true] %s125_s24 }
  0x8c   :  { %s1486_s0 = scalar_lea.hbm %s1892_s6, 16 }
  0x8d   :  { %p1487_p8 = scmp.ne.s32.totalorder %s1892_s6, %s1486_s0  ;;  %p1490_p9 = scmp.lt.u32.totalorder %s1486_s0, %s1892_s6 }
  0x8f   :  { %p1492_p10 = pnand %p1490_p9, %p1487_p8 }
  0x91   :  { %1495 = shalt.err (!%p1492_p10)
}
  0x92   :  { %s1496_s4 = scalar_lea.vmem %s102_s20, 16  ;;  %s1500_s17 = scalar_lea.vmem %s102_s20, 32 }
  0x93   :  { %p1497_p11 = scmp.ne.s32.totalorder %s102_s20, %s1496_s4  ;;  %p1501_p12 = scmp.lt.s32.totalorder %s102_s20, %s102_s20 }
  0x94   :  { %p1502_p13 = scmp.lt.s32.totalorder %s1500_s17, %s1496_s4 }
  0x96   :  { %p1503_p0 = por %p1502_p13, %p1501_p12 }
  0x98   :  { %p1504_p1 = pnand %p1503_p0, %p1497_p11 }
  0x9a   :  { %1507 = shalt.err (!%p1504_p1)
}
  0x9b   :  { %104 = dma.hbm_to_vmem [thread:$0]  %s1892_s6, 16, %s102_s20, [#allocation14]  }
  0x9c   :  { %s1508_s23 = scalar_lea.hbm %s1895_s9, 16 }
  0x9d   :  { %p1509_p2 = scmp.ne.s32.totalorder %s1895_s9, %s1508_s23  ;;  %p1512_p3 = scmp.lt.u32.totalorder %s1508_s23, %s1895_s9 }
  0x9f   :  { %p1514_p4 = pnand %p1512_p3, %p1509_p2 }
  0xa1   :  { %1517 = shalt.err (!%p1514_p4)
}
  0xa2   :  { %s1518_s16 = scalar_lea.vmem %s126_s24, 16  ;;  %s1522_s15 = scalar_lea.vmem %s126_s24, 32 }
  0xa3   :  { %p1519_p5 = scmp.ne.s32.totalorder %s126_s24, %s1518_s16  ;;  %p1523_p6 = scmp.lt.s32.totalorder %s126_s24, %s126_s24 }
  0xa4   :  { %p1524_p7 = scmp.lt.s32.totalorder %s1522_s15, %s1518_s16 }
  0xa6   :  { %p1525_p8 = por %p1524_p7, %p1523_p6 }
  0xa8   :  { %p1526_p9 = pnand %p1525_p8, %p1519_p5 }
  0xaa   :  { %1529 = shalt.err (!%p1526_p9)
}
  0xab   :  { %128 = dma.hbm_to_vmem [thread:$0]  %s1895_s9, 16, %s126_s24, [#allocation17]  }
  0xac   :  { %s1602_s22 = smov [#allocation21]   ;;  %s1530_s21 = scalar_lea.hbm %s1898_s12, 16 }
  0xad   :  { %s149_s27 = sshll.u32 %s1602_s22, 4  ;;  %p1531_p10 = scmp.ne.s32.totalorder %s1898_s12, %s1530_s21  ;;  %s150_s27 = int_to_ptr.vmem [resolvable:$true] %s149_s27 }
  0xae   :  { %p1534_p11 = scmp.lt.u32.totalorder %s1530_s21, %s1898_s12 }
  0xb0   :  { %p1536_p12 = pnand %p1534_p11, %p1531_p10 }
  0xb2   :  { %1539 = shalt.err (!%p1536_p12)
}
  0xb3   :  { %s1540_s17 = scalar_lea.vmem %s150_s27, 16  ;;  %s1544_s9 = scalar_lea.vmem %s150_s27, 32 }
  0xb4   :  { %p1541_p13 = scmp.ne.s32.totalorder %s150_s27, %s1540_s17  ;;  %p1545_p0 = scmp.lt.s32.totalorder %s150_s27, %s150_s27 }
  0xb5   :  { %p1546_p1 = scmp.lt.s32.totalorder %s1544_s9, %s1540_s17 }
  0xb7   :  { %p1547_p2 = por %p1546_p1, %p1545_p0 }
  0xb9   :  { %p1548_p3 = pnand %p1547_p2, %p1541_p13 }
  0xbb   :  { %1551 = shalt.err (!%p1548_p3)
}
  0xbc   :  { %152 = dma.hbm_to_vmem [thread:$0]  %s1898_s12, 16, %s150_s27, [#allocation20]  }
  0xbd   :  { %1574 = dma.done.wait [#allocation5], 1024  }
  0xbe   :  { %1575 = vsyncadd [#allocation5], 4294966272 }
  0xbf   :  { %1576 = dma.done.wait [#allocation8], 272  }
  0xc0   :  { %1577 = vsyncadd [#allocation8], 4294967024 }
  0xc1   :  { %1578 = dma.done.wait [#allocation11], 1040  }
  0xc2   :  { %1579 = vsyncadd [#allocation11], 4294966256 }
  0xc3   :  { %1580 = dma.done.wait [#allocation14], 272  }
  0xc4   :  { %1581 = vsyncadd [#allocation14], 4294967024 }
  0xc5   :  { %1582 = dma.done.wait [#allocation17], 1040  }
  0xc6   :  { %1583 = vsyncadd [#allocation17], 4294966256 }
  0xc7   :  { %1584 = dma.done.wait [#allocation20], 1040  }
  0xc8   :  { %1585 = vsyncadd [#allocation20], 4294966256  ;;  %v1250_v0 = vld [vmem:[#allocation7] sm:$0xff]   ;;  %v1251_v1 = vld [vmem:[#allocation7 + $0x8] sm:$0xff]   ;;  %vm304_vm0 = vcmask 261120  }
  0xc9   :  { %1138 = vmatprep.subr.bf16.mxu0 %v1250_v0  ;;  %v1821_v2 = vld [vmem:[#allocation4] sm:$0xff]  ;;  %v1823_v3 = vld [vmem:[#allocation4 + $0x8] sm:$0xff]  ;;  %v1827_v5 = vld [vmem:[#allocation4 + $0x10] sm:$0xff] }
  0xca   :  { %1139 = vmatpush3.bf16.msra.mxu0 %v1250_v0  ;;  %v288_v4 = vpack.c.bf16 %v1823_v3, %v1821_v2  ;;  %v1829_v6 = vld [vmem:[#allocation4 + $0x18] sm:$0xff]  ;;  %v1831_v7 = vld [vmem:[#allocation4 + $0x20] sm:$0xff]  ;;  %v1833_v8 = vld [vmem:[#allocation4 + $0x28] sm:$0xff] }
  0xcb   :  { %1140 = vmatprep.subr.bf16.mxu0 %v1251_v1  ;;  %v1252_v9 = vld [vmem:[#allocation10] sm:$0xff]   ;;  %v289_v10 = vpack.c.bf16 %v1829_v6, %v1827_v5  ;;  %v1253_v11 = vld [vmem:[#allocation10 + $0x8] sm:$0xff]   ;;  %v290_v12 = vpack.c.bf16 %v1833_v8, %v1831_v7  ;;  %v1254_v14 = vld [vmem:[#allocation10 + $0x10] sm:$0xff]  }
  0xcc   :  { %1142 = vmatprep.mubr.msk.bf16.mxu0 %vm304_vm0, %v288_v4  ;;  %1150 = vmatprep.subr.bf16.mxu1 %v1252_v9  ;;  %v1840_v13 = vld [vmem:[#allocation4 + $0x30] sm:$0xff]  ;;  %v1843_v15 = vld [vmem:[#allocation4 + $0x38] sm:$0xff]  ;;  %v1258_v20 = vld [vmem:[#allocation10 + $0x30] sm:$0xff]  }
  0xcd   :  { %1151 = vmatpush3.bf16.msra.mxu1 %v1252_v9  ;;  %v1255_v16 = vld [vmem:[#allocation10 + $0x18] sm:$0xff]   ;;  %v291_v17 = vpack.c.bf16 %v1843_v15, %v1840_v13  ;;  %v1256_v18 = vld [vmem:[#allocation10 + $0x20] sm:$0xff]   ;;  %v1257_v19 = vld [vmem:[#allocation10 + $0x28] sm:$0xff]  }
  0xce   :  { %1141 = vmatpush3.bf16.msra.mxu0 %v1251_v1  ;;  %1152 = vmatprep.subr.bf16.mxu1 %v1253_v11  ;;  %v1259_v21 = vld [vmem:[#allocation10 + $0x38] sm:$0xff]   ;;  %v1260_v51 = vld [vmem:[#allocation13] sm:$0xff]   ;;  %v1261_v52 = vld [vmem:[#allocation13 + $0x8] sm:$0xff]  }
  0xcf   :  { %v1002_v22 = vld [vmem:[#allocation9] ss:$0 sm:$0xff]  ;;  %1174 = vmatprep.subr.bf16.mxu0 %v1260_v51  ;;  %v1849_v53 = vld [vmem:[#allocation16] sm:$0xff]   ;;  %v1003_v54 = vld [vmem:[#allocation12] ss:$0 sm:$0xff] }
  0xd1   :  { %1143 = vmatmul.mubr.msk.bf16.vlgmr.msra.gmra.mrb[0].mxu0 %vm304_vm0, %v289_v10  ;;  %1153 = vmatpush3.bf16.msra.mxu1 %v1253_v11 }
  0xd2   :  { %1146 = vmatprep.mubr.msk.bf16.mxu0 %vm304_vm0, %v290_v12  ;;  %1154 = vmatprep.subr.bf16.mxu1 %v1254_v14 }
  0xd3   :  { %1175 = vmatpush3.bf16.msra.mxu0 %v1260_v51 }
  0xd4   :  { %1176 = vmatprep.subr.bf16.mxu0 %v1261_v52 }
  0xd5   :  { %1155 = vmatpush3.bf16.msra.mxu1 %v1254_v14 }
  0xd6   :  { %1156 = vmatprep.subr.bf16.mxu1 %v1255_v16 }
  0xd7   :  { %1177 = vmatpush3.bf16.msra.mxu0 %v1261_v52 }
  0xd8   :  { %1186 = vmatprep.subr.bf16.mxu0 %v1849_v53 }
  0xd9   :  { %1147 = vmatmul.mubr.msk.bf16.gmra.mrb[4].mxu0 %vm304_vm0, %v291_v17  ;;  %1157 = vmatpush3.bf16.msra.mxu1 %v1255_v16 }
  0xda   :  { %1158 = vmatprep.subr.bf16.mxu1 %v1256_v18 }
  0xdd   :  { %1159 = vmatpush3.bf16.msra.mxu1 %v1256_v18 }
  0xde   :  { %1160 = vmatprep.subr.bf16.mxu1 %v1257_v19 }
  0xe1   :  { %1161 = vmatpush3.bf16.msra.mxu1 %v1257_v19 }
  0xe2   :  { %1162 = vmatprep.subr.bf16.mxu1 %v1258_v20 }
  0xe5   :  { %1163 = vmatpush3.bf16.msra.mxu1 %v1258_v20 }
  0xe6   :  { %1164 = vmatprep.subr.bf16.mxu1 %v1259_v21 }
  0xe9   :  { %1165 = vmatpush3.bf16.msra.mxu1 %v1259_v21 }
 0x1a4   :  { %v1144_v23 = vpop.f32.mrb[0].mxu0 }
 0x1a5   :  { %v360_v24 = vadd.f32 %v1144_v23, %v1002_v22  ;;  %v351_v25 = vpop.f32.mrb[1].mxu0 }
 0x1a6   :  { %v352_v26 = vadd.f32 %v1002_v22, %v351_v25  ;;  %v1145_v27 = vpop.f32.mrb[2].mxu0 }
 0x1a7   :  { %v363_v28 = vadd.f32 %v1145_v27, %v1002_v22  ;;  %v354_v29 = vpop.f32.mrb[3].mxu0  ;;  %v384_v31 = vmax.f32 %v360_v24, 0.0 }
 0x1a8   :  { %v355_v30 = vadd.f32 %v1002_v22, %v354_v29  ;;  %v382_v33 = vmax.f32 %v352_v26, 0.0 }
 0x1a9   :  { %v385_v32 = vmax.f32 %v363_v28, 0.0 }
 0x1aa   :  { %v383_v34 = vmax.f32 %v355_v30, 0.0 }
 0x1ab   :  { %v391_v35 = vpack.c.bf16 %v385_v32, %v384_v31 }
 0x1ac   :  { %v1148_v36 = vpop.f32.mrb[4].mxu0  ;;  %v390_v37 = vpack.c.bf16 %v383_v34, %v382_v33 }
 0x1ad   :  { %v376_v38 = vadd.f32 %v1148_v36, %v1002_v22  ;;  %v367_v39 = vpop.f32.mrb[5].mxu0 }
 0x1ae   :  { %v368_v40 = vadd.f32 %v1002_v22, %v367_v39  ;;  %v1149_v41 = vpop.f32.mrb[6].mxu0  ;;  %1166 = vmatprep.mubr.bf16.mxu1 %v390_v37 }
 0x1af   :  { %v379_v42 = vadd.f32 %v1149_v41, %v1002_v22  ;;  %v370_v43 = vpop.f32.mrb[7].mxu0  ;;  %1167 = vmatmul.mubr.bf16.vlgmr.msra.gmra.mrb[0].mxu1 %v391_v35  ;;  %v388_v45 = vmax.f32 %v376_v38, 0.0 }
 0x1b0   :  { %v371_v44 = vadd.f32 %v1002_v22, %v370_v43  ;;  %v386_v47 = vmax.f32 %v368_v40, 0.0 }
 0x1b1   :  { %v389_v46 = vmax.f32 %v379_v42, 0.0 }
 0x1b2   :  { %v387_v48 = vmax.f32 %v371_v44, 0.0 }
 0x1b3   :  { %v393_v49 = vpack.c.bf16 %v389_v46, %v388_v45 }
 0x1b4   :  { %v392_v50 = vpack.c.bf16 %v387_v48, %v386_v47 }
 0x1b6   :  { %1170 = vmatprep.mubr.bf16.mxu1 %v392_v50 }
 0x1b7   :  { %1171 = vmatmul.mubr.bf16.gmra.mrb[4].mxu1 %v393_v49  ;;  %v1263_v49 = vld [vmem:[#allocation16 + $0x8] sm:$0xff]  }
 0x282   :  { %v1168_v55 = vpop.f32.mrb[0].mxu1 }
 0x283   :  { %v485_v56 = vadd.f32 %v1168_v55, %v1003_v54  ;;  %v476_v57 = vpop.f32.mrb[1].mxu1 }
 0x284   :  { %v477_v58 = vadd.f32 %v1003_v54, %v476_v57  ;;  %v1169_v59 = vpop.f32.mrb[2].mxu1 }
 0x285   :  { %v1023_v60 = vmul.f32 -1.442695, %v485_v56  ;;  %v488_v61 = vadd.f32 %v1169_v59, %v1003_v54  ;;  %v479_v62 = vpop.f32.mrb[3].mxu1  ;;  %v1271_v59 = vld [vmem:[#allocation19 + $0x8] sm:$0xff]  }
 0x286   :  { %v1021_v63 = vmul.f32 -1.442695, %v477_v58  ;;  %v480_v0 = vadd.f32 %v1003_v54, %v479_v62  ;;  %v1265_v58 = vld [vmem:[#allocation16 + $0x18] sm:$0xff]   ;;  %v1274_v62 = vld [vmem:[#allocation19 + $0x20] sm:$0xff]  }
 0x287   :  { %1278 = vpow2.f32 %v1023_v60  ;;  %v1024_v1 = vmul.f32 -1.442695, %v488_v61  ;;  %v1272_v60 = vld [vmem:[#allocation19 + $0x10] sm:$0xff]   ;;  %v1273_v61 = vld [vmem:[#allocation19 + $0x18] sm:$0xff]  }
 0x288   :  { %1280 = vpow2.f32 %v1021_v63  ;;  %v1022_v4 = vmul.f32 -1.442695, %v480_v0  ;;  %v1004_v63 = vld [vmem:[#allocation15] ss:$0 sm:$0xff] }
 0x289   :  { %1282 = vpow2.f32 %v1024_v1  ;;  %v664_v1 = vstv %s1893_s7 }
 0x28a   :  { %1284 = vpow2.f32 %v1022_v4  ;;  %v1172_v9 = vpop.f32.mrb[4].mxu1 }
 0x28b   :  { %v501_v10 = vadd.f32 %v1172_v9, %v1003_v54  ;;  %v492_v11 = vpop.f32.mrb[5].mxu1 }
 0x28c   :  { %v493_v12 = vadd.f32 %v1003_v54, %v492_v11  ;;  %v1173_v14 = vpop.f32.mrb[6].mxu1 }
 0x28d   :  { %v1027_v16 = vmul.f32 -1.442695, %v501_v10  ;;  %v504_v17 = vadd.f32 %v1173_v14, %v1003_v54  ;;  %v495_v18 = vpop.f32.mrb[7].mxu1 }
 0x28e   :  { %v1025_v19 = vmul.f32 -1.442695, %v493_v12  ;;  %v496_v20 = vadd.f32 %v1003_v54, %v495_v18 }
 0x28f   :  { %1286 = vpow2.f32 %v1027_v16  ;;  %v1028_v21 = vmul.f32 -1.442695, %v504_v17 }
 0x290   :  { %1288 = vpow2.f32 %v1025_v19  ;;  %v1026_v22 = vmul.f32 -1.442695, %v496_v20 }
 0x291   :  { %v1279_v23 = vpop.eup %1278  ;;  %1290 = vpow2.f32 %v1028_v21 }
 0x292   :  { %v1281_v24 = vpop.eup %1280  ;;  %v533_v25 = vadd.f32 1.0, %v1279_v23  ;;  %1292 = vpow2.f32 %v1026_v22 }
 0x293   :  { %v1283_v26 = vpop.eup %1282  ;;  %v531_v27 = vadd.f32 1.0, %v1281_v24 }
 0x294   :  { %v1285_v28 = vpop.eup %1284  ;;  %1294 = vrcp.f32 %v533_v25  ;;  %v534_v29 = vadd.f32 1.0, %v1283_v26 }
 0x295   :  { %1296 = vrcp.f32 %v531_v27  ;;  %v532_v30 = vadd.f32 1.0, %v1285_v28 }
 0x296   :  { %1298 = vrcp.f32 %v534_v29 }
 0x297   :  { %1300 = vrcp.f32 %v532_v30 }
 0x299   :  { %v1287_v31 = vpop.eup %1286 }
 0x29a   :  { %v1289_v32 = vpop.eup %1288  ;;  %v537_v33 = vadd.f32 1.0, %v1287_v31 }
 0x29b   :  { %v1291_v34 = vpop.eup %1290  ;;  %v535_v35 = vadd.f32 1.0, %v1289_v32 }
 0x29c   :  { %v1293_v36 = vpop.eup %1292  ;;  %1302 = vrcp.f32 %v537_v33  ;;  %v538_v37 = vadd.f32 1.0, %v1291_v34 }
 0x29d   :  { %1304 = vrcp.f32 %v535_v35  ;;  %v536_v38 = vadd.f32 1.0, %v1293_v36 }
 0x29e   :  { %v1295_v39 = vpop.eup %1294  ;;  %1306 = vrcp.f32 %v538_v37 }
 0x29f   :  { %v1297_v40 = vpop.eup %1296  ;;  %1308 = vrcp.f32 %v536_v38  ;;  %v557_v43 = vmul.f32 %v1295_v39, %v1827_v5 }
 0x2a0   :  { %v1299_v41 = vpop.eup %1298  ;;  %v555_v45 = vmul.f32 %v1297_v40, %v1821_v2  ;;  %v1264_v2 = vld [vmem:[#allocation16 + $0x10] sm:$0xff]  }
 0x2a1   :  { %v1301_v42 = vpop.eup %1300  ;;  %v558_v44 = vmul.f32 %v1299_v41, %v1829_v6 }
 0x2a2   :  { %v556_v46 = vmul.f32 %v1301_v42, %v1823_v3 }
 0x2a3   :  { %v564_v47 = vpack.c.bf16 %v558_v44, %v557_v43 }
 0x2a4   :  { %v563_v48 = vpack.c.bf16 %v556_v46, %v555_v45  ;;  %v1275_v45 = vld [vmem:[#allocation19 + $0x28] sm:$0xff]   ;;  %v1276_v46 = vld [vmem:[#allocation19 + $0x30] sm:$0xff]  }
 0x2a6   :  { %v1303_v50 = vpop.eup %1302  ;;  %1178 = vmatprep.mubr.msk.bf16.mxu0 %vm304_vm0, %v563_v48  ;;  %v1005_v48 = vld [vmem:[#allocation18] ss:$0 sm:$0xff] }
 0x2a7   :  { %v1305_v51 = vpop.eup %1304  ;;  %1179 = vmatmul.mubr.msk.bf16.vlgmr.msra.gmra.mrb[8].mxu0 %vm304_vm0, %v564_v47  ;;  %v561_v5 = vmul.f32 %v1303_v50, %v1840_v13  ;;  %v1266_v13 = vld [vmem:[#allocation16 + $0x20] sm:$0xff]   ;;  %v806_v50 = vstv %s1896_s10  ;;  %s1603_s10 = smov [#allocation22]  }
 0x2a8   :  { %v1307_v52 = vpop.eup %1306  ;;  %1187 = vmatpush3.bf16.msra.mxu0 %v1849_v53  ;;  %v559_v3 = vmul.f32 %v1305_v51, %v1831_v7  ;;  %v1268_v7 = vld [vmem:[#allocation16 + $0x30] sm:$0xff]   ;;  %v1270_v53 = vld [vmem:[#allocation19] sm:$0xff]   ;;  %v1277_v47 = vld [vmem:[#allocation19 + $0x38] sm:$0xff]   ;;  %s985_s3 = sshll.u32 %s1603_s10, 4  ;;  %s986_s3 = int_to_ptr.vmem [resolvable:$true] %s985_s3 }
 0x2a9   :  { %v1309_v54 = vpop.eup %1308  ;;  %v562_v6 = vmul.f32 %v1307_v52, %v1843_v15  ;;  %1188 = vmatprep.subr.bf16.mxu0 %v1263_v49  ;;  %v1267_v15 = vld [vmem:[#allocation16 + $0x28] sm:$0xff]   ;;  %1210 = vmatprep.subr.bf16.mxu1 %v1270_v53  ;;  %s1552_s23 = scalar_lea.vmem %s986_s3, 512  ;;  %p1557_p5 = scmp.lt.s32.totalorder %s986_s3, %s986_s3 }
 0x2aa   :  { %v560_v55 = vmul.f32 %v1309_v54, %v1833_v8  ;;  %v1269_v8 = vld [vmem:[#allocation16 + $0x38] sm:$0xff]   ;;  %1211 = vmatpush3.bf16.msra.mxu1 %v1270_v53  ;;  %p1553_p4 = scmp.ne.s32.totalorder %s986_s3, %s1552_s23  ;;  %p1558_p6 = scmp.lt.s32.totalorder %s1552_s23, %s1552_s23 }
 0x2ab   :  { %v566_v56 = vpack.c.bf16 %v562_v6, %v561_v5  ;;  %1212 = vmatprep.subr.bf16.mxu1 %v1271_v59 }
 0x2ac   :  { %v565_v57 = vpack.c.bf16 %v560_v55, %v559_v3  ;;  %1189 = vmatpush3.bf16.msra.mxu0 %v1263_v49  ;;  %p1559_p7 = por %p1558_p6, %p1557_p5 }
 0x2ad   :  { %1190 = vmatprep.subr.bf16.mxu0 %v1264_v2 }
 0x2ae   :  { %1182 = vmatprep.mubr.msk.bf16.mxu0 %vm304_vm0, %v565_v57  ;;  %1213 = vmatpush3.bf16.msra.mxu1 %v1271_v59  ;;  %p1560_p8 = pnand %p1559_p7, %p1553_p4 }
 0x2af   :  { %1183 = vmatmul.mubr.msk.bf16.gmra.mrb[12].mxu0 %vm304_vm0, %v566_v56  ;;  %1214 = vmatprep.subr.bf16.mxu1 %v1272_v60 }
 0x2b0   :  { %1191 = vmatpush3.bf16.msra.mxu0 %v1264_v2 }
 0x2b1   :  { %1192 = vmatprep.subr.bf16.mxu0 %v1265_v58 }
 0x2b2   :  { %1215 = vmatpush3.bf16.msra.mxu1 %v1272_v60 }
 0x2b3   :  { %1216 = vmatprep.subr.bf16.mxu1 %v1273_v61 }
 0x2b4   :  { %1193 = vmatpush3.bf16.msra.mxu0 %v1265_v58 }
 0x2b5   :  { %1194 = vmatprep.subr.bf16.mxu0 %v1266_v13 }
 0x2b6   :  { %1217 = vmatpush3.bf16.msra.mxu1 %v1273_v61 }
 0x2b7   :  { %1218 = vmatprep.subr.bf16.mxu1 %v1274_v62 }
 0x2b8   :  { %1195 = vmatpush3.bf16.msra.mxu0 %v1266_v13 }
 0x2b9   :  { %1196 = vmatprep.subr.bf16.mxu0 %v1267_v15 }
 0x2ba   :  { %1219 = vmatpush3.bf16.msra.mxu1 %v1274_v62 }
 0x2bb   :  { %1220 = vmatprep.subr.bf16.mxu1 %v1275_v45 }
 0x2bc   :  { %1197 = vmatpush3.bf16.msra.mxu0 %v1267_v15 }
 0x2bd   :  { %1198 = vmatprep.subr.bf16.mxu0 %v1268_v7 }
 0x2be   :  { %1221 = vmatpush3.bf16.msra.mxu1 %v1275_v45 }
 0x2bf   :  { %1222 = vmatprep.subr.bf16.mxu1 %v1276_v46 }
 0x2c0   :  { %1199 = vmatpush3.bf16.msra.mxu0 %v1268_v7 }
 0x2c1   :  { %1200 = vmatprep.subr.bf16.mxu0 %v1269_v8 }
 0x2c2   :  { %1223 = vmatpush3.bf16.msra.mxu1 %v1276_v46 }
 0x2c3   :  { %1224 = vmatprep.subr.bf16.mxu1 %v1277_v47 }
 0x2c4   :  { %1201 = vmatpush3.bf16.msra.mxu0 %v1269_v8 }
 0x2c6   :  { %1225 = vmatpush3.bf16.msra.mxu1 %v1277_v47 }
 0x37a   :  { %v1180_v0 = vpop.f32.mrb[8].mxu0 }
 0x37b   :  { %v634_v4 = vadd.f32 %v1180_v0, %v1004_v63  ;;  %v625_v9 = vpop.f32.mrb[9].mxu0 }
 0x37c   :  { %v626_v10 = vadd.f32 %v1004_v63, %v625_v9  ;;  %v1181_v11 = vpop.f32.mrb[10].mxu0 }
 0x37d   :  { %v667_v12 = vmul.f32 %v664_v1, %v634_v4  ;;  %v637_v14 = vadd.f32 %v1181_v11, %v1004_v63  ;;  %v628_v16 = vpop.f32.mrb[11].mxu0  ;;  %vm658_vm1 = vcmp.ge.f32.partialorder %v634_v4, 0.0 }
 0x37e   :  { %v665_v17 = vmul.f32 %v664_v1, %v626_v10  ;;  %v629_v18 = vadd.f32 %v1004_v63, %v628_v16  ;;  %vm656_vm2 = vcmp.ge.f32.partialorder %v626_v10, 0.0 }
 0x37f   :  { %vm659_vm3 = vcmp.ge.f32.partialorder %v637_v14, 0.0  ;;  %v668_v19 = vmul.f32 %v664_v1, %v637_v14  ;;  %v675_v21 = vsel %vm658_vm1, %v634_v4, %v667_v12 }
 0x380   :  { %vm657_vm4 = vcmp.ge.f32.partialorder %v629_v18, 0.0  ;;  %v666_v20 = vmul.f32 %v664_v1, %v629_v18  ;;  %v673_v25 = vsel %vm656_vm2, %v626_v10, %v665_v17 }
 0x381   :  { %v676_v22 = vsel %vm659_vm3, %v637_v14, %v668_v19 }
 0x382   :  { %v682_v23 = vpack.c.bf16 %v676_v22, %v675_v21  ;;  %v1184_v24 = vpop.f32.mrb[12].mxu0  ;;  %v674_v26 = vsel %vm657_vm4, %v629_v18, %v666_v20 }
 0x383   :  { %v650_v27 = vadd.f32 %v1184_v24, %v1004_v63  ;;  %v641_v28 = vpop.f32.mrb[13].mxu0  ;;  %v681_v29 = vpack.c.bf16 %v674_v26, %v673_v25 }
 0x384   :  { %v642_v30 = vadd.f32 %v1004_v63, %v641_v28  ;;  %v1185_v31 = vpop.f32.mrb[14].mxu0 }
 0x385   :  { %v671_v32 = vmul.f32 %v664_v1, %v650_v27  ;;  %v653_v33 = vadd.f32 %v1185_v31, %v1004_v63  ;;  %v644_v34 = vpop.f32.mrb[15].mxu0  ;;  %1202 = vmatprep.mubr.bf16.mxu0 %v681_v29  ;;  %vm662_vm5 = vcmp.ge.f32.partialorder %v650_v27, 0.0 }
 0x386   :  { %v669_v35 = vmul.f32 %v664_v1, %v642_v30  ;;  %v645_v36 = vadd.f32 %v1004_v63, %v644_v34  ;;  %1203 = vmatmul.mubr.bf16.vlgmr.msra.gmra.mrb[16].mxu0 %v682_v23  ;;  %vm660_vm6 = vcmp.ge.f32.partialorder %v642_v30, 0.0  ;;  %v1006_v23 = vld [vmem:[#allocation21] ss:$0 sm:$0xff] }
 0x387   :  { %vm663_vm7 = vcmp.ge.f32.partialorder %v653_v33, 0.0  ;;  %v672_v37 = vmul.f32 %v664_v1, %v653_v33  ;;  %v679_v39 = vsel %vm662_vm5, %v650_v27, %v671_v32 }
 0x388   :  { %vm661_vm8 = vcmp.ge.f32.partialorder %v645_v36, 0.0  ;;  %v670_v38 = vmul.f32 %v664_v1, %v645_v36  ;;  %v677_v41 = vsel %vm660_vm6, %v642_v30, %v669_v35 }
 0x389   :  { %v680_v40 = vsel %vm663_vm7, %v653_v33, %v672_v37 }
 0x38a   :  { %v678_v42 = vsel %vm661_vm8, %v645_v36, %v670_v38  ;;  %v684_v43 = vpack.c.bf16 %v680_v40, %v679_v39 }
 0x38b   :  { %v683_v44 = vpack.c.bf16 %v678_v42, %v677_v41 }
 0x38d   :  { %1206 = vmatprep.mubr.bf16.mxu0 %v683_v44 }
 0x38e   :  { %1207 = vmatmul.mubr.bf16.gmra.mrb[20].mxu0 %v684_v43 }
 0x459   :  { %v1204_v49 = vpop.f32.mrb[16].mxu0 }
 0x45a   :  { %v776_v51 = vadd.f32 %v1204_v49, %v1005_v48  ;;  %v767_v52 = vpop.f32.mrb[17].mxu0 }
 0x45b   :  { %v768_v54 = vadd.f32 %v1005_v48, %v767_v52  ;;  %v1205_v5 = vpop.f32.mrb[18].mxu0 }
 0x45c   :  { %v809_v6 = vmul.f32 %v806_v50, %v776_v51  ;;  %v779_v2 = vadd.f32 %v1205_v5, %v1005_v48  ;;  %v770_v3 = vpop.f32.mrb[19].mxu0  ;;  %vm800_vm9 = vcmp.ge.f32.partialorder %v776_v51, 0.0 }
 0x45d   :  { %v807_v55 = vmul.f32 %v806_v50, %v768_v54  ;;  %v771_v56 = vadd.f32 %v1005_v48, %v770_v3  ;;  %vm798_vm10 = vcmp.ge.f32.partialorder %v768_v54, 0.0 }
 0x45e   :  { %vm801_vm11 = vcmp.ge.f32.partialorder %v779_v2, 0.0  ;;  %v810_v57 = vmul.f32 %v806_v50, %v779_v2  ;;  %v817_v13 = vsel %vm800_vm9, %v776_v51, %v809_v6 }
 0x45f   :  { %vm799_vm12 = vcmp.ge.f32.partialorder %v771_v56, 0.0  ;;  %v808_v58 = vmul.f32 %v806_v50, %v771_v56  ;;  %v815_v53 = vsel %vm798_vm10, %v768_v54, %v807_v55 }
 0x460   :  { %v818_v15 = vsel %vm801_vm11, %v779_v2, %v810_v57 }
 0x461   :  { %v824_v7 = vpack.c.bf16 %v818_v15, %v817_v13  ;;  %v1208_v8 = vpop.f32.mrb[20].mxu0  ;;  %v816_v59 = vsel %vm799_vm12, %v771_v56, %v808_v58 }
 0x462   :  { %v792_v60 = vadd.f32 %v1208_v8, %v1005_v48  ;;  %v783_v61 = vpop.f32.mrb[21].mxu0  ;;  %v823_v62 = vpack.c.bf16 %v816_v59, %v815_v53 }
 0x463   :  { %v784_v63 = vadd.f32 %v1005_v48, %v783_v61  ;;  %v1209_v0 = vpop.f32.mrb[22].mxu0 }
 0x464   :  { %v813_v1 = vmul.f32 %v806_v50, %v792_v60  ;;  %v795_v4 = vadd.f32 %v1209_v0, %v1005_v48  ;;  %v786_v9 = vpop.f32.mrb[23].mxu0  ;;  %1226 = vmatprep.mubr.bf16.mxu1 %v823_v62  ;;  %vm804_vm13 = vcmp.ge.f32.partialorder %v792_v60, 0.0 }
 0x465   :  { %v811_v10 = vmul.f32 %v806_v50, %v784_v63  ;;  %v787_v11 = vadd.f32 %v1005_v48, %v786_v9  ;;  %1227 = vmatmul.mubr.bf16.vlgmr.msra.gmra.mrb[8].mxu1 %v824_v7  ;;  %vm802_vm14 = vcmp.ge.f32.partialorder %v784_v63, 0.0 }
 0x466   :  { %vm805_vm15 = vcmp.ge.f32.partialorder %v795_v4, 0.0  ;;  %v814_v12 = vmul.f32 %v806_v50, %v795_v4  ;;  %v821_v16 = vsel %vm804_vm13, %v792_v60, %v813_v1 }
 0x467   :  { %vm803_vm0 = vcmp.ge.f32.partialorder %v787_v11, 0.0  ;;  %v812_v14 = vmul.f32 %v806_v50, %v787_v11  ;;  %v819_v18 = vsel %vm802_vm14, %v784_v63, %v811_v10 }
 0x468   :  { %v822_v17 = vsel %vm805_vm15, %v795_v4, %v814_v12 }
 0x469   :  { %v820_v19 = vsel %vm803_vm0, %v787_v11, %v812_v14  ;;  %v826_v20 = vpack.c.bf16 %v822_v17, %v821_v16 }
 0x46a   :  { %v825_v21 = vpack.c.bf16 %v820_v19, %v819_v18 }
 0x46c   :  { %1230 = vmatprep.mubr.bf16.mxu1 %v825_v21 }
 0x46d   :  { %1231 = vmatmul.mubr.bf16.gmra.mrb[12].mxu1 %v826_v20 }
 0x538   :  { %v1228_v22 = vpop.f32.mrb[8].mxu1 }
 0x539   :  { %v909_v24 = vpop.f32.mrb[9].mxu1  ;;  %v918_v26 = vadd.f32 %v1228_v22, %v1006_v23 }
 0x53a   :  { %v1229_v25 = vpop.f32.mrb[10].mxu1  ;;  %v910_v29 = vadd.f32 %v1006_v23, %v909_v24 }
 0x53b   :  { %v921_v27 = vadd.f32 %v1229_v25, %v1006_v23  ;;  %v912_v28 = vpop.f32.mrb[11].mxu1 }
 0x53c   :  { %v913_v30 = vadd.f32 %v1006_v23, %v912_v28 }
 0x53d   :  { %v1075_v31 = vpack.c.bf16 %v921_v27, %v918_v26 }
 0x53e   :  { %v1070_v32 = vpack.c.bf16 %v913_v30, %v910_v29 }
 0x53f   :  { %1087 = vst [vmem:[#allocation22 + $0x8] sm:$0xff] %v1075_v31  }
 0x540   :  { %1071 = vst [vmem:[#allocation22] sm:$0xff] %v1070_v32   ;;  %v1232_v33 = vpop.f32.mrb[12].mxu1 }
 0x541   :  { %v925_v34 = vpop.f32.mrb[13].mxu1  ;;  %v934_v36 = vadd.f32 %v1232_v33, %v1006_v23 }
 0x542   :  { %v1233_v35 = vpop.f32.mrb[14].mxu1  ;;  %v926_v39 = vadd.f32 %v1006_v23, %v925_v34 }
 0x543   :  { %v937_v37 = vadd.f32 %v1233_v35, %v1006_v23  ;;  %v928_v38 = vpop.f32.mrb[15].mxu1 }
 0x544   :  { %v929_v40 = vadd.f32 %v1006_v23, %v928_v38 }
 0x545   :  { %v1085_v41 = vpack.c.bf16 %v937_v37, %v934_v36 }
 0x546   :  { %v1080_v42 = vpack.c.bf16 %v929_v40, %v926_v39 }
 0x547   :  { %1089 = vst [vmem:[#allocation22 + $0x18] sm:$0xff] %v1085_v41  }
 0x548   :  { %1088 = vst [vmem:[#allocation22 + $0x10] sm:$0xff] %v1080_v42  }
 0x549   :  { %1563 = shalt.err (!%p1560_p8)
}
 0x54a   :  { %s1564_s8 = scalar_lea.hbm %s1899_s13, 512 }
 0x54b   :  { %p1565_p9 = scmp.ne.s32.totalorder %s1899_s13, %s1564_s8  ;;  %p1568_p10 = scmp.lt.u32.totalorder %s1564_s8, %s1899_s13 }
 0x54d   :  { %p1570_p11 = pnand %p1568_p10, %p1565_p9 }
 0x54f   :  { %1573 = shalt.err (!%p1570_p11)
}
 0x550   :  { %991 = dma.vmem_to_hbm [thread:$0]  %s986_s3, 512, %s1899_s13, [#allocation6], %s1589_s18, %s1589_s18, %s1590_s19  }
 0x551   :  { %1586 = dma.done.wait [#allocation6], 512  }
 0x552   :  { %1587 = vsyncadd [#allocation6], 4294966784 }
 0x553   :  { %995 = vsyncpa [#allocation5], 1 }
 0x554   :  { %996 = vsyncpa [#allocation8], 1 }
 0x555   :  { %997 = vsyncpa [#allocation11], 1 }
 0x556   :  { %998 = vsyncpa [#allocation14], 1 }
 0x557   :  { %999 = vsyncpa [#allocation17], 1 }
 0x558   :  { %1000 = vsyncpa [#allocation20], 1 }
 0x559   :  { %1001 = vsyncpa [#allocation6], 1 }

</bundles_post_ra>
